<compile_context>
chip_gen: v6e
topology: v6e:2x2x1
jax: 0.10.0
libtpu: 0.0.40
codegen_flags: <defaults>
</compile_context>

<pallas_src>
import jax
import jax.numpy as jnp
import numpy as np
from jax.experimental import pallas as pl
from jax.experimental.pallas import tpu as pltpu


def mean_pool_kernel(m_ref, x_ref, o_ref):
    # m_ref: (1, R, 1, 1)  0/1 mask for this batch element
    # x_ref: (1, R, Pb, T) read-level embeddings block
    # o_ref: (1, Pb, T)    pooled output block
    w = m_ref[0]                              # (R, 1, 1)
    x = x_ref[0]                              # (R, Pb, T)
    cnt = jnp.sum(w)                          # number of non-empty reads
    pooled = jnp.sum(x * w, axis=0)           # (Pb, T) masked sum on the VPU
    # NaN when cnt == 0, matching torch's 0/0 behaviour.
    o_ref[...] = (pooled * (1.0 / cnt))[None]


def _choose_block_p(P, R, T, itemsize=4, budget_bytes=4 << 20):
    """Largest multiple-of-8 divisor of P whose x block fits the VMEM budget."""
    if P % 8 != 0:
        return P                              # full dim is always a legal block
    best = 8
    for bp in range(8, P + 1, 8):
        if P % bp == 0 and R * bp * T * itemsize <= budget_bytes:
            best = bp
    return best


@jax.jit
def mean_pool(x, non_empty_position_mask):
    """x: (B, R, P, T) float; mask: (B, R) bool/int.  Returns (B, P, T) f32."""
    x = x.astype(jnp.float32)
    B, R, P, T = x.shape
    m = non_empty_position_mask.astype(jnp.float32)[:, :, None, None]  # (B,R,1,1)

    block_p = _choose_block_p(P, R, T)
    grid = (B, P // block_p)

    return pl.pallas_call(
        mean_pool_kernel,
        out_shape=jax.ShapeDtypeStruct((B, P, T), jnp.float32),
        grid_spec=pltpu.PrefetchScalarGridSpec(
            num_scalar_prefetch=0,
            grid=grid,
            in_specs=[
                pl.BlockSpec((1, R, 1, 1), lambda b, p: (b, 0, 0, 0)),
                pl.BlockSpec((1, R, block_p, T), lambda b, p: (b, 0, p, 0)),
            ],
            out_specs=pl.BlockSpec((1, block_p, T), lambda b, p: (b, p, 0)),
        ),
        compiler_params=pltpu.CompilerParams(
            dimension_semantics=("parallel", "parallel")),
    )(m, x)


# ----------------------------- pure-JAX reference ----------------------------
def ref_mean_pool(x, mask):
    m = mask.astype(x.dtype)
    depths = m.sum(-1)
    return (x * m[..., None, None]).sum(axis=1) / depths[..., None, None]


if __name__ == "__main__":
    key = jax.random.PRNGKey(0)
    B, R, P, T = 2, 8, 16, 128                # (batch, read_depth, positions, transformer_size)
    kx, km = jax.random.split(key)

    x = jax.random.normal(kx, (B, R, P, T), jnp.float32)
    mask = jax.random.bernoulli(km, 0.6, (B, R))
    mask = mask.at[:, 0].set(True)            # guarantee >=1 non-empty read per batch

    out = jax.block_until_ready(mean_pool(x, mask))
    assert out.shape == (B, P, T), out.shape

    ref = jax.block_until_ready(ref_mean_pool(x, mask))
    np.testing.assert_allclose(np.asarray(out), np.asarray(ref),
                               rtol=1e-5, atol=1e-5)
    print("KERNEL_OK")
</pallas_src>

<mosaic_0001>
module attributes {stable_mosaic.version = 11 : i64} {
  func.func @mean_pool_kernel(%arg0: i32, %arg1: i32, %arg2: memref<1x8x1x1xf32, #tpu.memory_space<vmem>>, %arg3: memref<1x8x16x128xf32, #tpu.memory_space<vmem>>, %arg4: memref<1x16x128xf32, #tpu.memory_space<vmem>>) attributes {dimension_semantics = [#tpu.dimension_semantics<parallel>, #tpu.dimension_semantics<parallel>], iteration_bounds = array<i64: 2, 1>, scalar_prefetch = 0 : i64, scratch_operands = 0 : i64, tpu.core_type = #tpu.core_type<tc>, window_params = [{transform_indices = @transform_0, window_bounds = array<i64: 1, 8, 1, 1>}, {transform_indices = @transform_1, window_bounds = array<i64: 1, 8, 16, 128>}, {transform_indices = @transform_2, window_bounds = array<i64: 1, 16, 128>}]} {
    %c0 = arith.constant 0 : index
    %c0_0 = arith.constant 0 : index
    %c0_1 = arith.constant 0 : index
    %c0_2 = arith.constant 0 : index
    %0 = vector.load %arg2[%c0, %c0_0, %c0_1, %c0_2] : memref<1x8x1x1xf32, #tpu.memory_space<vmem>>, vector<1x8x1x1xf32>
    %1 = vector.shape_cast %0 : vector<1x8x1x1xf32> to vector<8x1x1xf32>
    %c0_3 = arith.constant 0 : index
    %c0_4 = arith.constant 0 : index
    %c0_5 = arith.constant 0 : index
    %c0_6 = arith.constant 0 : index
    %2 = vector.load %arg3[%c0_3, %c0_4, %c0_5, %c0_6] : memref<1x8x16x128xf32, #tpu.memory_space<vmem>>, vector<1x8x16x128xf32>
    %3 = vector.shape_cast %2 : vector<1x8x16x128xf32> to vector<8x16x128xf32>
    %4 = vector.shape_cast %1 : vector<8x1x1xf32> to vector<1x8x1x1xf32>
    %cst = arith.constant dense<0.000000e+00> : vector<1xf32>
    %5 = vector.multi_reduction <add>, %4, %cst [1, 2, 3] : vector<1x8x1x1xf32> to vector<1xf32>
    %6 = vector.shape_cast %5 : vector<1xf32> to vector<1x1x1x1xf32>
    %7 = vector.extract %6[0, 0, 0, 0] : f32 from vector<1x1x1x1xf32>
    %8 = vector.broadcast %1 : vector<8x1x1xf32> to vector<8x16x128xf32>
    %9 = arith.mulf %3, %8 : vector<8x16x128xf32>
    %cst_7 = arith.constant dense<0.000000e+00> : vector<16x128xf32>
    %10 = vector.multi_reduction <add>, %9, %cst_7 [0] : vector<8x16x128xf32> to vector<16x128xf32>
    %cst_8 = arith.constant 1.000000e+00 : f32
    %11 = arith.divf %cst_8, %7 : f32
    %12 = vector.broadcast %11 : f32 to vector<16x128xf32>
    %13 = arith.mulf %10, %12 : vector<16x128xf32>
    %14 = vector.shape_cast %13 : vector<16x128xf32> to vector<1x16x128xf32>
    %c0_9 = arith.constant 0 : index
    %c0_10 = arith.constant 0 : index
    %c0_11 = arith.constant 0 : index
    %15 = vector.load %arg4[%c0_9, %c0_10, %c0_11] : memref<1x16x128xf32, #tpu.memory_space<vmem>>, vector<1x16x128xf32>
    tpu.vector_store %arg4[%c0_9, %c0_10, %c0_11], %14 {strides = array<i32>} : memref<1x16x128xf32, #tpu.memory_space<vmem>>, vector<1x16x128xf32>,
    return
  }
  func.func @transform_0(%arg0: i32, %arg1: i32) -> (i32, i32, i32, i32) {
    %c0_i32 = arith.constant 0 : i32
    %c0_i32_0 = arith.constant 0 : i32
    %c0_i32_1 = arith.constant 0 : i32
    %c0_i32_2 = arith.constant 0 : i32
    return %arg0, %c0_i32, %c0_i32_0, %c0_i32_1 : i32, i32, i32, i32
  }
  func.func @transform_1(%arg0: i32, %arg1: i32) -> (i32, i32, i32, i32) {
    %c0_i32 = arith.constant 0 : i32
    %c0_i32_0 = arith.constant 0 : i32
    %c0_i32_1 = arith.constant 0 : i32
    return %arg0, %c0_i32, %arg1, %c0_i32_0 : i32, i32, i32, i32
  }
  func.func @transform_2(%arg0: i32, %arg1: i32) -> (i32, i32, i32) {
    %c0_i32 = arith.constant 0 : i32
    %c0_i32_0 = arith.constant 0 : i32
    return %arg0, %arg1, %c0_i32 : i32, i32, i32
  }
}

</mosaic_0001>

<bundles_post_ra>
// kernel: mean_pool.1
= control target key start
LH: loop header
LB: loop body
LE: loop exit
PB: predicated region body
PF: predicated region fallthrough
CT: control target
= control target key end

     0   :  { %7 = vsyncpa [#allocation3], 0  ;;  %s876_s0 = inlined_call_operand.vmem [shape: f32[2,8,1,1], index: 0, kind: input, shape index: {}]   ;;  %s877_s1 = inlined_call_operand.hbm [shape: f32[2,8,16,128], index: 1, kind: input, shape index: {}]   ;;  %s878_s2 = inlined_call_operand.hbm [shape: f32[2,16,128], index: 2, kind: output, shape index: {}]  }
   0x1   :  { %9 = vsyncpa [#allocation3 + $0x1], 0 }
   0x2   :  { %10 = vsyncpa [#allocation4], 0 }
   0x3   :  { %12 = vsyncpa [#allocation4 + $0x1], 0  ;;  %s698_s9 = smov 0   ;;  %s700_s10 = smov 0  }
   0x4   :  { %s702_s11 = smov 0   ;;  %s704_s12 = smov 0  }
   0x5   :  { %s706_s13 = smov 0   ;;  %s708_s14 = smov 0  }
   0x6 LB: > { %s473_s15 = sadd.s32 4294967295, %s674_s14   ;;  %s474_s16 = sadd.s32 4294967294, %s674_s14   ;;  %s674_s14 = sphi %s708_s14, %s18_s14   ;;  %s670_s13 = sphi %s706_s13, %s889_s13   ;;  %s666_s12 = sphi %s704_s12, %s888_s12   ;;  %s662_s11 = sphi %s702_s11, %s887_s11   ;;  %s658_s10 = sphi %s700_s10, %s886_s10   ;;  %s654_s9 = sphi %s698_s9, %s885_s9  }
   0x7   : > { %s30_s17 = sadd.s32 1, %s670_s13  ;;  %s65_s18 = sadd.s32 1, %s662_s11 }
   0x8   : > { %p32_p0 = scmp.ge.s32.totalorder %s30_s17, 2  ;;  %p72_p1 = scmp.ne.s32.totalorder %s662_s11, %s658_s10 }
   0x9   : > { %p73_p2 = scmp.eq.s32.totalorder %s674_s14, 0  ;;  %p78_p3 = scmp.ne.s32.totalorder %s658_s10, %s654_s9 }
   0xa   : > { %s891_s17 = smov (%p32_p0, %s30_s17), 0  ;;  %p79_p5 = scmp.eq.s32.totalorder %s473_s15, 0 }
   0xb   : > { %p739_p4 = por %p73_p2, %p72_p1  ;;  %s60_s20 = ssub.s32 %s670_s13, %s891_s17 }
   0xc   : > { %p104_p6 = scmp.eq.s32.totalorder %s473_s15, 1  ;;  %p63_p7 = scmp.eq.s32.totalorder %s60_s20, 0 }
   0xd   : > { %p745_p8 = por %p79_p5, %p78_p3  ;;  %p110_p10 = scmp.eq.s32.totalorder %s474_s16, 1 }
   0xe   : > { %p749_p9 = por %p104_p6, %p72_p1  ;;  %p507_p13 = scmp.lt.s32.totalorder %s674_s14, 2 }
   0xf   : > { %s754_s23 = scalar_select %p63_p7, %s662_s11, %s65_s18  }
  0x10   : > { %p756_p11 = por %p110_p10, %p78_p3  ;;  %s137_s25 = sand.u32 1, %s662_s11  }
  0x11   : > { %s477_s26 = sshll.u32 %s137_s25, 7  ;;  %s489_s27 = sshll.u32 %s670_s13, 11 }
  0x12   : > { %s149_s30 = scalar_lea.hbm %s877_s1, %s489_s27  ;;  %s141_s3 = scalar_lea.vmem [#allocation2], %s477_s26 }
  0x13   : > { %s150_s4 = sshll.u32 %s141_s3, 4  ;;  %p769_p0 = pnand %p507_p13, %p739_p4  ;;  %s151_s4 = int_to_ptr.vmem [resolvable:$true] %s150_s4 }
  0x14   : > { %p480_p1 = scmp.ge.s32.totalorder %s674_s14, 1  ;;  %s138_s6 = scalar_lea.sflag [#allocation3], %s137_s25 }
  0x15   : > { %p568_p2 = pneg %p769_p0  ;;  %s579_s7 = scalar_lea.vmem %s151_s4, 2048 }
  0x16   : > { %p580_p3 = scmp.ne.s32.totalorder %s151_s4, %s579_s7  ;;  %s676_s8 = smov [#allocation2]  }
  0x17   : > { %s584_s15 = sshll.u32 %s676_s8, 4  ;;  %s585_s15 = int_to_ptr.vmem [resolvable:$false] %s584_s15 }
  0x18   : > { %p582_p5 = pnand %p580_p3, %p568_p2  ;;  %s586_s16 = scalar_lea.vmem %s585_s15, 4096 }
  0x19   : > { %p587_p7 = scmp.lt.s32.totalorder %s151_s4, %s585_s15  ;;  %p588_p10 = scmp.lt.s32.totalorder %s586_s16, %s579_s7 }
  0x1a   : > { %p583_p6 = pneg %p582_p5 }
  0x1b   : > { %p589_p12 = por %p588_p10, %p587_p7 }
  0x1d   : > { %p590_p4 = pnand %p589_p12, %p583_p6 }
  0x1f   : > { %593 = shalt.err (!%p590_p4)
}
  0x20   : > { %s677_s18 = smov 128   ;;  %s678_s19 = smov 8  }
  0x21   : > { %502 = dma.hbm_to_vmem [thread:$0]  (!%p769_p0), %s149_s30, 2048, %s151_s4, %s138_s6, %s677_s18, %s677_s18, %s678_s19  }
  0x22   : > { %p158_p13 = scmp.lt.s32.totalorder %s674_s14, 3 }
  0x24   : > { %p159_p2 = pnand %p480_p1, %p158_p13 }
  0x25   : > { %s782_s20 = sand.u32 (!%p159_p2), 1, %s658_s10  }
  0x26   : > { %162 = sbr.rel (%p159_p2) target bundleno = 348 (0x15c), region = 28  ;;  %s481_s25 = sshll.u32 (!%p159_p2), %s782_s20, 7 }
  0x27   : > { %s165_s26 = scalar_lea.sflag (!%p159_p2), [#allocation3], %s782_s20  ;;  %s786_s27 = scalar_lea.vmem (!%p159_p2), [#allocation2], %s481_s25 }
  0x2b   : > { %645 = dma.done.wait (%p745_p8), %s165_s26, 2048  }
  0x2c   : > { %647 = vsyncadd (%p745_p8), %s165_s26, 4294965248  ;;  %p193_p12 = scmp.lt.s32.totalorder %s666_s12, 1  ;;  %v256_v0 = vlaneseq  ;;  %v679_v1 = vmov 0   ;;  %vm223_vm0 = vcmask 0   ;;  %v209_v46 = vld [vmem:[%s786_s27 + $0x10] sm:$0xff]  ;;  %v210_v47 = vld [vmem:[%s786_s27 + $0x18] sm:$0xff] }
  0x2d   : > { %563 = vset.pattern.permute.xlu1 %v679_v1  ;;  %562 = vset.pattern.permute.xlu0 %v679_v1  ;;  %v207_v49 = vld [vmem:[%s786_s27] sm:$0xff]  ;;  %v208_v50 = vld [vmem:[%s786_s27 + $0x8] sm:$0xff]  ;;  %v213_v63 = vld [vmem:[%s786_s27 + $0x30] sm:$0xff]  ;;  %s482_s5 = sshll.u32 %s782_s20, 4  ;;  %s490_s8 = sshll.u32 %s666_s12, 8 }
  0x2e   : > { %s194_s28 = scalar_select %p193_p12, %s666_s12, 1  ;;  %v257_v2 = vshrl.u32 %v256_v0, 7  ;;  %v211_v56 = vld [vmem:[%s786_s27 + $0x20] sm:$0xff]  ;;  %v212_v57 = vld [vmem:[%s786_s27 + $0x28] sm:$0xff]  ;;  %v214_v0 = vld [vmem:[%s786_s27 + $0x38] sm:$0xff] }
  0x2f   : > { %s192_s6 = scalar_lea.vmem [#allocation5], %s482_s5  ;;  %s828_s19 = scalar_lea.hbm %s878_s2, %s490_s8 }
  0x30   : > { %s483_s29 = sshll.u32 %s194_s28, 3  ;;  %v258_v3 = vsub.s32 0, %v257_v2  ;;  %s374_s7 = sshll.u32 %s192_s6, 4  ;;  %s823_s7 = int_to_ptr.vmem [resolvable:$true] %s374_s7 }
  0x31   : > { %s196_s4 = scalar_lea.vmem %s876_s0, %s483_s29  ;;  %s359_s25 = scalar_lea.sflag [#allocation4], %s782_s20 }
  0x32   : > { %v199_v4 = vld [vmem:[%s196_s4] sm:$0x1]  ;;  %v200_v5 = vld [vmem:[%s196_s4 + $0x1] sm:$0x1]  ;;  %v201_v6 = vld [vmem:[%s196_s4 + $0x2] sm:$0x1] }
  0x33   : > { %v202_v7 = vld [vmem:[%s196_s4 + $0x3] sm:$0x1]  ;;  %v263_v8 = vrot.slane %v200_v5, %v258_v3  ;;  %v224_v9 = vsel %vm223_vm0, %v199_v4, 0.0  ;;  %v225_v10 = vsel %vm223_vm0, %v200_v5, 0.0  ;;  %v203_v11 = vld [vmem:[%s196_s4 + $0x4] sm:$0x1]  ;;  %v267_v14 = vrot.slane %v201_v6, %v258_v3 }
  0x34   : > { %v226_v12 = vadd.f32 %v225_v10, %v224_v9  ;;  %v227_v13 = vsel %vm223_vm0, %v201_v6, 0.0  ;;  %v229_v15 = vsel %vm223_vm0, %v202_v7, 0.0  ;;  %v204_v16 = vld [vmem:[%s196_s4 + $0x5] sm:$0x1]  ;;  %v231_v18 = vsel %vm223_vm0, %v203_v11, 0.0  ;;  %v216_v6 = vld [vmem:[%s786_s27 + $0x48] sm:$0xff] }
  0x35   : > { %293 = vperm.xlu1 %563, %v263_v8   ;;  %v205_v19 = vld [vmem:[%s196_s4 + $0x6] sm:$0x1]  ;;  %v271_v21 = vrot.slane %v202_v7, %v258_v3  ;;  %v233_v22 = vsel %vm223_vm0, %v204_v16, 0.0  ;;  %v206_v23 = vld [vmem:[%s196_s4 + $0x7] sm:$0x1]  ;;  %v275_v27 = vrot.slane %v203_v11, %v258_v3  ;;  %v279_v31 = vrot.slane %v204_v16, %v258_v3  ;;  %s594_s12 = scalar_lea.vmem %s823_s7, 256 }
  0x36   : > { %v228_v17 = vadd.f32 %v227_v13, %v226_v12  ;;  %v235_v25 = vsel %vm223_vm0, %v205_v19, 0.0  ;;  %v237_v28 = vsel %vm223_vm0, %v206_v23, 0.0  ;;  %v283_v32 = vrot.slane %v205_v19, %v258_v3  ;;  %v215_v5 = vld [vmem:[%s786_s27 + $0x40] sm:$0xff]  ;;  %v217_v12 = vld [vmem:[%s786_s27 + $0x50] sm:$0xff]  ;;  %v218_v13 = vld [vmem:[%s786_s27 + $0x58] sm:$0xff]  ;;  %p595_p8 = scmp.ne.s32.totalorder %s823_s7, %s594_s12  ;;  %s680_s26 = smov [#allocation5]  }
  0x37   : > { %v287_v33 = vrot.slane %v206_v23, %v258_v3  ;;  %v259_v34 = vrot.slane %v199_v4, %v258_v3  ;;  %v219_v19 = vld [vmem:[%s786_s27 + $0x60] sm:$0xff] }
  0x38   : > { %v230_v20 = vadd.f32 %v229_v15, %v228_v17  ;;  %p596_p0 = pnand %p595_p8, %p749_p9 }
  0x39   : > { %297 = vperm.xlu1 %563, %v267_v14  }
  0x3a   : > { %v232_v24 = vadd.f32 %v231_v18, %v230_v20  ;;  %v220_v20 = vld [vmem:[%s786_s27 + $0x68] sm:$0xff]  ;;  %p597_p1 = pneg %p596_p0 }
  0x3c   : > { %v234_v26 = vadd.f32 %v233_v22, %v232_v24 }
  0x3d   : > { %301 = vperm.xlu1 %563, %v271_v21  }
  0x3e   : > { %v236_v29 = vadd.f32 %v235_v25, %v234_v26  ;;  %v221_v25 = vld [vmem:[%s786_s27 + $0x70] sm:$0xff]  ;;  %v222_v26 = vld [vmem:[%s786_s27 + $0x78] sm:$0xff]  ;;  %s598_s27 = sshll.u32 %s680_s26, 4  ;;  %s599_s27 = int_to_ptr.vmem [resolvable:$false] %s598_s27 }
  0x3f   : > { %s600_s28 = scalar_lea.vmem %s599_s27, 512  ;;  %p601_p3 = scmp.lt.s32.totalorder %s823_s7, %s599_s27 }
  0x40   : > { %v238_v30 = vadd.f32 %v237_v28, %v236_v29  ;;  %p602_p5 = scmp.lt.s32.totalorder %s600_s28, %s594_s12 }
  0x41   : > { %305 = vperm.xlu1 %563, %v275_v27  }
  0x42   : > { %239 = vadd.xlane.f32.xlu0 %v238_v30  ;;  %p603_p6 = por %p602_p5, %p601_p3 }
  0x44   : > { %p604_p7 = pnand %p603_p6, %p597_p1 }
  0x45   : > { %309 = vperm.xlu1 %563, %v279_v31  }
  0x49   : > { %313 = vperm.xlu1 %563, %v283_v32  }
  0x4d   : > { %317 = vperm.xlu1 %563, %v287_v33  }
  0x58   : > { %289 = vperm.xlu0 %562, %v259_v34  }
  0xb0   : > { %v294_v44 = vpop.permute.xlu1 %293 }
  0xb1   : > { %v322_v52 = vmul.f32 %v294_v44, %v209_v46  ;;  %v323_v53 = vmul.f32 %v294_v44, %v210_v47 }
  0xb4   : > { %v298_v45 = vpop.permute.xlu1 %297 }
  0xb5   : > { %v324_v59 = vmul.f32 %v298_v45, %v211_v56  ;;  %v325_v60 = vmul.f32 %v298_v45, %v212_v57 }
  0xb8   : > { %v302_v48 = vpop.permute.xlu1 %301 }
  0xb9   : > { %v326_v1 = vmul.f32 %v302_v48, %v213_v63  ;;  %v327_v2 = vmul.f32 %v302_v48, %v214_v0 }
  0xbc   : > { %v306_v58 = vpop.permute.xlu1 %305 }
  0xbd   : > { %v328_v8 = vmul.f32 %v306_v58, %v215_v5  ;;  %v329_v9 = vmul.f32 %v306_v58, %v216_v6 }
  0xc0   : > { %v310_v7 = vpop.permute.xlu1 %309 }
  0xc1   : > { %v330_v15 = vmul.f32 %v310_v7, %v217_v12  ;;  %v331_v16 = vmul.f32 %v310_v7, %v218_v13 }
  0xc4   : > { %v314_v14 = vpop.permute.xlu1 %313 }
  0xc5   : > { %v332_v23 = vmul.f32 %v314_v14, %v219_v19  ;;  %v333_v24 = vmul.f32 %v314_v14, %v220_v20 }
  0xc8   : > { %v318_v27 = vpop.permute.xlu1 %317 }
  0xc9   : > { %v334_v30 = vmul.f32 %v318_v27, %v221_v25  ;;  %v335_v31 = vmul.f32 %v318_v27, %v222_v26 }
  0xcb   : > { %v240_v35 = vpop.xlane.xlu0 %239 }
  0xcc   : > { %v241_v36 = vrot.slane %v240_v35, 4 }
  0xce   : > { %v242_v37 = vadd.f32 %v241_v36, %v240_v35 }
  0xd0   : > { %v243_v38 = vrot.slane %v242_v37, 2 }
  0xd2   : > { %v244_v39 = vadd.f32 %v243_v38, %v242_v37 }
  0xd3   : > { %v290_v51 = vpop.permute.xlu0 %289 }
  0xd4   : > { %v245_v40 = vrot.slane %v244_v39, 1  ;;  %v320_v54 = vmul.f32 %v290_v51, %v207_v49  ;;  %v321_v55 = vmul.f32 %v290_v51, %v208_v50 }
  0xd6   : > { %v246_v41 = vadd.f32 %v245_v40, %v244_v39  ;;  %v336_v61 = vadd.f32 %v322_v52, %v320_v54  ;;  %v343_v62 = vadd.f32 %v323_v53, %v321_v55 }
  0xd8   : > { %491 = vpush %v246_v41  ;;  %v337_v3 = vadd.f32 %v336_v61, %v324_v59  ;;  %v344_v4 = vadd.f32 %v343_v62, %v325_v60 }
  0xda   : > { %v338_v10 = vadd.f32 %v337_v3, %v326_v1  ;;  %v345_v11 = vadd.f32 %v344_v4, %v327_v2 }
  0xdc   : > { %v339_v17 = vadd.f32 %v338_v10, %v328_v8  ;;  %v346_v18 = vadd.f32 %v345_v11, %v329_v9 }
  0xde   : > { %v340_v21 = vadd.f32 %v339_v17, %v330_v15  ;;  %v347_v22 = vadd.f32 %v346_v18, %v331_v16 }
  0xe0   : > { %v341_v28 = vadd.f32 %v340_v21, %v332_v23  ;;  %v348_v29 = vadd.f32 %v347_v22, %v333_v24 }
  0xe2   : > { %v342_v32 = vadd.f32 %v341_v28, %v334_v30  ;;  %v349_v33 = vadd.f32 %v348_v29, %v335_v31 }
 0x109   : > { %s492_s21 = spop %491 }
 0x10a   : > { %v350_v42 = vstv %s492_s21 }
 0x10b   : > { %564 = vrcp.f32 %v350_v42 }
 0x118   : > { %v565_v43 = vpop.eup %564 }
 0x119   : > { %493 = vpush %v565_v43 }
 0x14a   : > { %s494_s15 = spop %493 }
 0x14b   : > { %v353_v34 = vstv %s494_s15 }
 0x14c   : > { %v354_v35 = vmul.f32 %v353_v34, %v342_v32  ;;  %v355_v36 = vmul.f32 %v353_v34, %v349_v33 }
 0x14e   : > { %356 = vst [vmem:[%s192_s6] sm:$0xff] %v354_v35  ;;  %357 = vst [vmem:[%s192_s6 + $0x8] sm:$0xff] %v355_v36 }
 0x14f   : > { %607 = shalt.err (!%p604_p7)
}
 0x150   : > { %s608_s29 = scalar_lea.hbm %s828_s19, 256  ;;  %s612_s4 = scalar_lea.hbm %s878_s2, 512 }
 0x151   : > { %p609_p10 = scmp.ne.s32.totalorder %s828_s19, %s608_s29  ;;  %p613_p2 = scmp.lt.s32.totalorder %s828_s19, %s878_s2 }
 0x152   : > { %p614_p12 = scmp.lt.s32.totalorder %s612_s4, %s608_s29 }
 0x153   : > { %p610_p4 = pnand %p609_p10, %p749_p9 }
 0x154   : > { %p615_p8 = por %p614_p12, %p613_p2 }
 0x155   : > { %p611_p13 = pneg %p610_p4 }
 0x157   : > { %p616_p0 = pnand %p615_p8, %p611_p13 }
 0x159   : > { %619 = shalt.err (!%p616_p0)
}
 0x15a   : > { %s681_s6 = smov 128   ;;  %s682_s8 = smov 8  }
 0x15b   : > { %497 = dma.vmem_to_hbm [thread:$0]  (%p749_p9), %s823_s7, 256, %s828_s19, %s359_s25, %s681_s6, %s681_s6, %s682_s8  }
 0x15c PF: > { %s389_s15 = sand.u32 1, %s654_s9   ;;  %p884_p1 = scmp.ge.s32.totalorder %s674_s14, 2 }
 0x15d   : > { %s390_s16 = scalar_lea.sflag [#allocation4], %s389_s15 }
 0x15e   : > { %p504_p3 = pnand %p884_p1, %p756_p11 }
 0x160   : > { %p505_p5 = pneg %p504_p3 }
 0x162   : > { %649 = dma.done.wait (%p505_p5), %s390_s16, 256  }
 0x163   : > { %651 = vsyncadd (%p505_p5), %s390_s16, 4294967040  ;;  %s18_s14 = sadd.s32 1, %s674_s14   ;;  %s885_s9 = smov %s658_s10 }
 0x164   : > { %p15_p6 = scmp.ge.s32.totalorder %s18_s14, 4   ;;  %s886_s10 = smov %s662_s11 }
 0x165   : > { %s887_s11 = smov %s754_s23  ;;  %s888_s12 = smov %s670_s13 }
 0x166   : > { %s889_s13 = smov %s891_s17  ;;  %17 = sbr.rel (!%p15_p6) target bundleno = 6 (0x6), region = 76 }
 0x16b   :  { %395 = vsyncpa [#allocation3], 1 }
 0x16c   :  { %397 = vsyncpa [#allocation3 + $0x1], 1 }
 0x16d   :  { %398 = vsyncpa [#allocation4], 1 }
 0x16e   :  { %400 = vsyncpa [#allocation4 + $0x1], 1 }

</bundles_post_ra>
